<compile_context>
chip_gen: v6e
topology: v6e:2x2x1
jax: 0.10.0
libtpu: 0.0.40
codegen_flags: <defaults>
</compile_context>

<pallas_src>
import functools

import jax
import jax.numpy as jnp
from jax.experimental import pallas as pl
from jax.experimental.pallas import tpu as pltpu

EPS = 0.2


def _smooth_loss_kernel(pred_ref, gold_ref, out_ref, *, n_true, c_true, tile_n):
    pid = pl.program_id(0)

    pred = pred_ref[...].astype(jnp.float32)      # (tile_n, C) upcast in-kernel
    gold = gold_ref[...]                           # (tile_n, 1) int32
    tn, c = pred.shape

    # Numerically stable log-softmax pieces; single exp pass over the tile.
    m = jnp.max(pred, axis=1, keepdims=True)                        # (tn, 1)
    exp_sum = jnp.sum(jnp.exp(pred - m), axis=1, keepdims=True)     # (tn, 1)
    lse = jnp.log(exp_sum)                                          # (tn, 1)

    # Gold-class logit via a masked row-sum; plain row-sum for the smoothing
    # term. Both are taken directly from `pred` (no masked/shifted temporaries).
    col = jax.lax.broadcasted_iota(jnp.int32, (tn, c), 1)
    pred_gold = jnp.sum(jnp.where(col == gold, pred, 0.0),
                        axis=1, keepdims=True)                      # (tn, 1)
    sum_pred = jnp.sum(pred, axis=1, keepdims=True)                 # (tn, 1)

    logp_gold = (pred_gold - m) - lse
    # sum_c log_softmax = sum_c pred - C*m - C*lse
    sum_logp = (sum_pred - c_true * m) - c_true * lse

    # -(one_hot_smooth * logp).sum(1)
    #   = -[(1 - eps - eps/(C-1)) * logp_gold + eps/(C-1) * sum_logp]
    w_gold = 1.0 - EPS - EPS / (c_true - 1)
    w_all = EPS / (c_true - 1)
    row_loss = -(w_gold * logp_gold + w_all * sum_logp)             # (tn, 1)

    # Mask garbage rows of the (possibly ragged) last batch tile.  jnp.where
    # does not propagate NaN/Inf from the unselected branch, so un-padded
    # out-of-bounds pred/gold data is harmless.
    row_idx = pid * tile_n + jax.lax.broadcasted_iota(jnp.int32, (tn, 1), 0)
    row_loss = jnp.where(row_idx < n_true, row_loss, 0.0)

    # Per-tile partial sum; the cross-tile sum and divide-by-N happen in JAX.
    out_ref[...] = jnp.sum(row_loss, axis=(0, 1), keepdims=True)    # (1, 1)


def smooth_loss(pred: jax.Array, gold: jax.Array, *, max_tile_n: int = 1024,
                vmem_budget_bytes: int = 24 << 20) -> jax.Array:
    """pred: (N, C) float (any float dtype), gold: (N,) int labels. Scalar f32 loss."""
    n, c = pred.shape

    # Rows per tile, budgeted on the f32 working set:
    #   2 x (tn * c_lanes * itemsize)  -- double-buffered native input block
    # + 3 x (tn * c_lanes * 4)         -- f32 upcast / exp / select temporaries
    # kept under vmem_budget_bytes (safe against v7x's 64 MiB physical VMEM,
    # comfortably large on v5e/v6e's 128 MiB).
    c_lanes = int(pl.cdiv(c, 128)) * 128            # VMEM lane-layout padding
    itemsize = jnp.dtype(pred.dtype).itemsize
    bytes_per_row = 2 * c_lanes * itemsize + 3 * c_lanes * 4
    tn = int(vmem_budget_bytes // bytes_per_row)
    tn = min(tn, max_tile_n, int(pl.cdiv(n, 8)) * 8)
    tn = max(8, (tn // 8) * 8)
    n_tiles = int(pl.cdiv(n, tn))

    gold2d = gold.reshape(-1, 1).astype(jnp.int32)  # (N, 1), tiny

    kernel = functools.partial(_smooth_loss_kernel, n_true=n, c_true=c, tile_n=tn)

    partials = pl.pallas_call(
        kernel,
        out_shape=jax.ShapeDtypeStruct((n_tiles, 1), jnp.float32),
        grid=(n_tiles,),
        in_specs=[
            # Full-C block: exempt from the 128-lane divisibility rule, so no
            # wrapper-side padding of the class axis is needed.
            pl.BlockSpec((tn, c), lambda i: (i, 0)),
            pl.BlockSpec((tn, 1), lambda i: (i, 0)),
        ],
        # One independent (1,1) partial per tile -> batch axis can be
        # "parallel" (sharded across both TensorCores on v7x).
        out_specs=pl.BlockSpec((1, 1), lambda i: (i, 0)),
        compiler_params=pltpu.CompilerParams(
            dimension_semantics=("parallel",),
            vmem_limit_bytes=48 << 20,
        ),
    )(pred, gold2d)

    # TODO(synk): for vocab-scale C add a second grid axis over C with an
    # online logsumexp (running m / l / sum_pred / pred_gold in scratch); a
    # single full-C row block is sufficient for classification-sized C here.
    return jnp.sum(partials) / n


def _smooth_loss_ref(pred, gold):
    n, c = pred.shape
    one_hot = jax.nn.one_hot(gold, c, dtype=jnp.float32)
    one_hot = one_hot * (1.0 - EPS) + (1.0 - one_hot) * (EPS / (c - 1))
    log_prb = jax.nn.log_softmax(pred.astype(jnp.float32), axis=1)
    return -(one_hot * log_prb).sum(axis=1).mean()


if __name__ == "__main__":
    key = jax.random.PRNGKey(0)
    k_pred, k_gold, k_pred2, k_gold2 = jax.random.split(key, 4)

    # Small shapes consistent with the module: batch of logits over classes.
    N, C = 8, 32
    pred = jax.random.normal(k_pred, (N, C), dtype=jnp.float32)
    gold = jax.random.randint(k_gold, (N,), 0, C, dtype=jnp.int32)

    loss = jax.block_until_ready(smooth_loss(pred, gold))
    ref = _smooth_loss_ref(pred, gold)
    assert jnp.allclose(loss, ref, atol=1e-5, rtol=1e-5), (loss, ref)

    # Second check: bf16 logits, non-aligned C, multi-step grid with a ragged
    # last batch tile (forced small tile).
    N2, C2 = 40, 40
    pred2 = jax.random.normal(k_pred2, (N2, C2), dtype=jnp.bfloat16)
    gold2 = jax.random.randint(k_gold2, (N2,), 0, C2, dtype=jnp.int32)
    loss2 = jax.block_until_ready(smooth_loss(pred2, gold2, max_tile_n=16))
    ref2 = _smooth_loss_ref(pred2, gold2)
    assert jnp.allclose(loss2, ref2, atol=1e-3, rtol=1e-3), (loss2, ref2)

    print("KERNEL_OK")
</pallas_src>

<mosaic_0001>
module attributes {stable_mosaic.version = 11 : i64} {
  func.func @_smooth_loss_kernel(%arg0: i32, %arg1: memref<8x32xf32, #tpu.memory_space<vmem>>, %arg2: memref<8x1xi32, #tpu.memory_space<vmem>>, %arg3: memref<1x1xf32, #tpu.memory_space<vmem>>) attributes {dimension_semantics = [#tpu.dimension_semantics<parallel>], iteration_bounds = array<i64: 1>, scalar_prefetch = 0 : i64, scratch_operands = 0 : i64, tpu.core_type = #tpu.core_type<tc>, window_params = [{transform_indices = @transform_0, window_bounds = array<i64: 8, 32>}, {transform_indices = @transform_1, window_bounds = array<i64: 8, 1>}, {transform_indices = @transform_2, window_bounds = array<i64: 1, 1>}]} {
    %c0 = arith.constant 0 : index
    %c0_0 = arith.constant 0 : index
    %0 = vector.load %arg1[%c0, %c0_0] : memref<8x32xf32, #tpu.memory_space<vmem>>, vector<8x32xf32>
    %c0_1 = arith.constant 0 : index
    %c0_2 = arith.constant 0 : index
    %1 = vector.load %arg2[%c0_1, %c0_2] : memref<8x1xi32, #tpu.memory_space<vmem>>, vector<8x1xi32>
    %cst = arith.constant dense<0xFF800000> : vector<8xf32>
    %2 = vector.multi_reduction <maximumf>, %0, %cst [1] : vector<8x32xf32> to vector<8xf32>
    %3 = vector.shape_cast %2 : vector<8xf32> to vector<8x1xf32>
    %4 = vector.broadcast %3 : vector<8x1xf32> to vector<8x32xf32>
    %5 = arith.subf %0, %4 : vector<8x32xf32>
    %6 = math.exp %5 : vector<8x32xf32>
    %cst_3 = arith.constant dense<0.000000e+00> : vector<8xf32>
    %7 = vector.multi_reduction <add>, %6, %cst_3 [1] : vector<8x32xf32> to vector<8xf32>
    %8 = vector.shape_cast %7 : vector<8xf32> to vector<8x1xf32>
    %9 = math.log %8 : vector<8x1xf32>
    %10 = tpu.iota {dimensions = array<i32: 1>} : vector<8x32xi32>
    %11 = vector.broadcast %1 : vector<8x1xi32> to vector<8x32xi32>
    %12 = arith.cmpi eq, %10, %11 : vector<8x32xi32>
    %cst_4 = arith.constant 0.000000e+00 : f32
    %13 = vector.broadcast %cst_4 : f32 to vector<8x32xf32>
    %14 = arith.select %12, %0, %13 : vector<8x32xi1>, vector<8x32xf32>
    %cst_5 = arith.constant dense<0.000000e+00> : vector<8xf32>
    %15 = vector.multi_reduction <add>, %14, %cst_5 [1] : vector<8x32xf32> to vector<8xf32>
    %16 = vector.shape_cast %15 : vector<8xf32> to vector<8x1xf32>
    %cst_6 = arith.constant dense<0.000000e+00> : vector<8xf32>
    %17 = vector.multi_reduction <add>, %0, %cst_6 [1] : vector<8x32xf32> to vector<8xf32>
    %18 = vector.shape_cast %17 : vector<8xf32> to vector<8x1xf32>
    %19 = arith.subf %16, %3 : vector<8x1xf32>
    %20 = arith.subf %19, %9 : vector<8x1xf32>
    %cst_7 = arith.constant 3.200000e+01 : f32
    %21 = vector.broadcast %cst_7 : f32 to vector<8x1xf32>
    %22 = arith.mulf %21, %3 : vector<8x1xf32>
    %23 = arith.subf %18, %22 : vector<8x1xf32>
    %cst_8 = arith.constant 3.200000e+01 : f32
    %24 = vector.broadcast %cst_8 : f32 to vector<8x1xf32>
    %25 = arith.mulf %24, %9 : vector<8x1xf32>
    %26 = arith.subf %23, %25 : vector<8x1xf32>
    %cst_9 = arith.constant 0.793548405 : f32
    %27 = vector.broadcast %cst_9 : f32 to vector<8x1xf32>
    %28 = arith.mulf %27, %20 : vector<8x1xf32>
    %cst_10 = arith.constant 0.0064516128 : f32
    %29 = vector.broadcast %cst_10 : f32 to vector<8x1xf32>
    %30 = arith.mulf %29, %26 : vector<8x1xf32>
    %31 = arith.addf %28, %30 : vector<8x1xf32>
    %cst_11 = arith.constant 0.000000e+00 : f32
    %32 = vector.broadcast %cst_11 : f32 to vector<8x1xf32>
    %33 = arith.subf %32, %31 : vector<8x1xf32>
    %c8_i32 = arith.constant 8 : i32
    %34 = arith.muli %arg0, %c8_i32 : i32
    %35 = tpu.iota {dimensions = array<i32: 0>} : vector<8x1xi32>
    %36 = vector.broadcast %34 : i32 to vector<8x1xi32>
    %37 = arith.addi %36, %35 : vector<8x1xi32>
    %c8_i32_12 = arith.constant 8 : i32
    %38 = vector.broadcast %c8_i32_12 : i32 to vector<8x1xi32>
    %39 = arith.cmpi slt, %37, %38 : vector<8x1xi32>
    %cst_13 = arith.constant 0.000000e+00 : f32
    %40 = vector.broadcast %cst_13 : f32 to vector<8x1xf32>
    %41 = arith.select %39, %33, %40 : vector<8x1xi1>, vector<8x1xf32>
    %42 = vector.shape_cast %41 : vector<8x1xf32> to vector<1x8x1xf32>
    %cst_14 = arith.constant dense<0.000000e+00> : vector<1xf32>
    %43 = vector.multi_reduction <add>, %42, %cst_14 [1, 2] : vector<1x8x1xf32> to vector<1xf32>
    %44 = vector.shape_cast %43 : vector<1xf32> to vector<1x1x1xf32>
    %45 = vector.extract %44[0, 0, 0] : f32 from vector<1x1x1xf32>
    %46 = vector.broadcast %45 : f32 to vector<1x1xf32>
    %c0_15 = arith.constant 0 : index
    %c0_16 = arith.constant 0 : index
    %47 = vector.load %arg3[%c0_15, %c0_16] : memref<1x1xf32, #tpu.memory_space<vmem>>, vector<1x1xf32>
    tpu.vector_store %arg3[%c0_15, %c0_16], %46 {strides = array<i32>} : memref<1x1xf32, #tpu.memory_space<vmem>>, vector<1x1xf32>,
    return
  }
  func.func @transform_0(%arg0: i32) -> (i32, i32) {
    %c0_i32 = arith.constant 0 : i32
    %c0_i32_0 = arith.constant 0 : i32
    return %arg0, %c0_i32 : i32, i32
  }
  func.func @transform_1(%arg0: i32) -> (i32, i32) {
    %c0_i32 = arith.constant 0 : i32
    %c0_i32_0 = arith.constant 0 : i32
    return %arg0, %c0_i32 : i32, i32
  }
  func.func @transform_2(%arg0: i32) -> (i32, i32) {
    %c0_i32 = arith.constant 0 : i32
    %c0_i32_0 = arith.constant 0 : i32
    return %arg0, %c0_i32 : i32, i32
  }
}

</mosaic_0001>

<bundles_post_ra>
// kernel: tpu_custom_call.1
= control target key start
LH: loop header
LB: loop body
LE: loop exit
PB: predicated region body
PF: predicated region fallthrough
CT: control target
= control target key end

     0   :  { %vm14_vm0 = vcmask 261120   ;;  %s145_s0 = inlined_call_operand.vmem [shape: f32[8,32], index: 0, kind: input, shape index: {}]   ;;  %s146_s1 = inlined_call_operand.vmem [shape: s32[8,1], index: 1, kind: input, shape index: {}]   ;;  %s147_s2 = inlined_call_operand.hbm [shape: f32[1,1], index: 2, kind: output, shape index: {}]  }
   0x1   :  { %v12_v0 = vld [vmem:[%s145_s0] sm:$0xff] }
   0x2   :  { %7 = vsyncpa [#allocation3], 0  ;;  %v15_v1 = vsel %vm14_vm0, %v12_v0, -inf  ;;  %v115_v2 = vmov 0   ;;  %v13_v3 = vld [vmem:[%s146_s1] sm:$0xff]  ;;  %v26_v7 = vlaneseq  ;;  %v36_v14 = vsel %vm14_vm0, %v12_v0, 0.0 }
   0x3   :  { %88 = vset.pattern.permute.xlu0 %v115_v2  ;;  %vm56_vm2 = vcmask 7168   ;;  %s116_s0 = smov [#allocation2]   ;;  %vm68_vm3 = vcmask 0  }
   0x4   :  { %16 = vmax.xlane.f32.xlu0 %v15_v1  ;;  %v27_v8 = vand.u32 127, %v26_v7  ;;  %s76_s1 = sshll.u32 %s116_s0, 4  ;;  %s77_s1 = int_to_ptr.vmem [resolvable:$true] %s76_s1 }
   0x5   :  { %s93_s14 = scalar_lea.vmem %s77_s1, 16  ;;  %s97_s15 = scalar_lea.vmem %s77_s1, 32 }
   0x6   :  { %p94_p0 = scmp.ne.s32.totalorder %s77_s1, %s93_s14  ;;  %p98_p1 = scmp.lt.s32.totalorder %s77_s1, %s77_s1 }
   0x7   :  { %p99_p2 = scmp.lt.s32.totalorder %s97_s15, %s93_s14 }
   0x9   :  { %p100_p3 = por %p99_p2, %p98_p1 }
   0xb   :  { %p101_p4 = pnand %p100_p3, %p94_p0 }
  0x1a   :  { %29 = vperm.xlu0 %88, %v13_v3  }
  0x8d   :  { %v17_v4 = vpop.xlane.xlu0 %16 }
  0x8e   :  { %v18_v5 = vsub.f32 %v12_v0, %v17_v4  ;;  %v41_v21 = vmul.f32 32.0, %v17_v4 }
  0x90   :  { %v19_v6 = vmul.f32 1.442695, %v18_v5 }
  0x92   :  { %89 = vpow2.f32 %v19_v6 }
  0x95   :  { %v30_v9 = vpop.permute.xlu0 %29 }
  0x96   :  { %vm31_vm1 = vcmp.eq.s32.totalorder %v27_v8, %v30_v9 }
  0x97   :  { %v32_v11 = vsel %vm31_vm1, %v12_v0, 0.0 }
  0x98   :  { %v33_v13 = vsel %vm14_vm0, %v32_v11, 0.0 }
  0x9f   :  { %v90_v10 = vpop.eup %89 }
  0xa0   :  { %v21_v12 = vsel %vm14_vm0, %v90_v10, 0.0 }
  0xa1   :  { %22 = vadd.xlane.f32.xlu1 %v21_v12 }
  0xa5   :  { %34 = vadd.xlane.f32.xlu1 %v33_v13 }
  0xa9   :  { %37 = vadd.xlane.f32.xlu1 %v36_v14 }
 0x12a   :  { %v23_v15 = vpop.xlane.xlu1 %22 }
 0x12b   :  { %91 = vlog2.f32 %v23_v15 }
 0x12e   :  { %v35_v16 = vpop.xlane.xlu1 %34 }
 0x12f   :  { %v39_v20 = vsub.f32 %v35_v16, %v17_v4 }
 0x132   :  { %v38_v18 = vpop.xlane.xlu1 %37 }
 0x133   :  { %v42_v24 = vsub.f32 %v38_v18, %v41_v21 }
 0x138   :  { %v92_v17 = vpop.eup %91 }
 0x139   :  { %v25_v19 = vmul.f32 0.6931472, %v92_v17 }
 0x13b   :  { %v40_v22 = vsub.f32 %v39_v20, %v25_v19  ;;  %v43_v23 = vmul.f32 32.0, %v25_v19 }
 0x13d   :  { %v44_v25 = vsub.f32 %v42_v24, %v43_v23  ;;  %v45_v26 = vmul.f32 0.7935484, %v40_v22 }
 0x13f   :  { %v46_v27 = vmul.f32 0.006451613, %v44_v25 }
 0x141   :  { %v47_v28 = vadd.f32 %v46_v27, %v45_v26 }
 0x143   :  { %v48_v29 = vsub.f32 0.0, %v47_v28 }
 0x145   :  { %v57_v30 = vsel %vm56_vm2, %v48_v29, 0.0 }
 0x146   :  { %58 = vadd.xlane.f32.xlu1 %v57_v30 }
 0x1cf   :  { %v59_v31 = vpop.xlane.xlu1 %58 }
 0x1d0   :  { %v60_v32 = vrot.slane %v59_v31, 4 }
 0x1d2   :  { %v61_v33 = vadd.f32 %v60_v32, %v59_v31 }
 0x1d4   :  { %v62_v34 = vrot.slane %v61_v33, 2 }
 0x1d6   :  { %v63_v35 = vadd.f32 %v62_v34, %v61_v33 }
 0x1d8   :  { %v64_v36 = vrot.slane %v63_v35, 1 }
 0x1da   :  { %v65_v37 = vadd.f32 %v64_v36, %v63_v35 }
 0x1dc   :  { %84 = vpush %v65_v37 }
 0x20d   :  { %s85_s13 = spop %84 }
 0x20e   :  { %v67_v38 = vstv %s85_s13 }
 0x20f   :  { %69 = vst.msk [vmem:[#allocation2] sm:$0x1] %vm68_vm3, %v67_v38 }
 0x210   :  { %104 = shalt.err (!%p101_p4)
}
 0x211   :  { %79 = dma.vmem_to_hbm [thread:$0]  %s77_s1, 16, %s147_s2, [#allocation3]  }
 0x212   :  { %113 = dma.done.wait [#allocation3], 16  }
 0x213   :  { %114 = vsyncadd [#allocation3], 4294967280 }
 0x214   :  { %83 = vsyncpa [#allocation3], 1 }

</bundles_post_ra>
